<compile_context>
chip_gen: v6e
topology: v6e:2x2x1
jax: 0.10.0
libtpu: 0.0.40
codegen_flags: <defaults>
</compile_context>

<pallas_src>
import functools

import jax
import jax.numpy as jnp
import numpy as np
from jax.experimental import pallas as pl
from jax.experimental.pallas import tpu as pltpu

_LANE = 128
_SUBLANE = 8


def _round_up(x, m):
    return (x + m - 1) // m * m


def _encoder_kernel(x_ref, w_ref, b_ref, o_ref, *, no_imgnorm):
    # x_ref: (tm, Kp) bf16, w_ref: (Kp, Ep) bf16, b_ref: (1, Ep) f32,
    # o_ref: (tm, Ep) f32.  Padded columns of w/b are zero, so padded output
    # lanes are zero and do not perturb the row norm.
    y = jnp.dot(x_ref[...], w_ref[...], preferred_element_type=jnp.float32)
    y = y + b_ref[...]                                    # f32 bias add
    if no_imgnorm:
        o_ref[...] = y.astype(o_ref.dtype)
    else:
        # l2norm (matches reference: norm = sqrt(sum(x^2)) + eps; x / norm)
        norm = jnp.sqrt(jnp.sum(y * y, axis=-1, keepdims=True)) + 1e-8
        o_ref[...] = (y * pl.reciprocal(norm, approx=True)).astype(o_ref.dtype)


def encoder_image_precomp(images, weight_t, bias, *, no_imgnorm=False, tm=256):
    """images: [..., img_dim]; weight_t: [img_dim, embed]; bias: [embed].

    tm: row tile.  256 is a good default; sweep 256-512 (v5e/v7x) or up to
    512-1024 (v6e, 128 MiB VMEM) for large batches.
    """
    img_dim, embed = weight_t.shape
    lead_shape = images.shape[:-1]
    x2d = images.reshape(-1, img_dim)
    n = x2d.shape[0]

    # Lane-dense padding of the feature dims (multiple of 128).
    k_p = _round_up(img_dim, _LANE)
    e_p = _round_up(embed, _LANE)

    # Row tile: as large as requested but no larger than the (padded) row
    # count; keep it a multiple of the sublane count.
    tm = max(_SUBLANE, min(_round_up(tm, _SUBLANE), _round_up(n, _SUBLANE)))
    # Prefer >=2 grid steps so both TensorCores get work on v7x megacore.
    if _round_up(n, tm) // tm < 2 and tm >= 2 * _SUBLANE:
        tm = _round_up(tm // 2, _SUBLANE)
    n_p = _round_up(n, tm)
    grid = (n_p // tm,)

    # bf16 operands for the MXU; bias stays f32 (epilogue is f32).
    x_p = jnp.zeros((n_p, k_p), jnp.bfloat16).at[:n, :img_dim].set(
        x2d.astype(jnp.bfloat16))
    w_p = jnp.zeros((k_p, e_p), jnp.bfloat16).at[:img_dim, :embed].set(
        weight_t.astype(jnp.bfloat16))
    b_p = jnp.zeros((1, e_p), jnp.float32).at[:, :embed].set(
        bias.astype(jnp.float32).reshape(1, embed))

    kernel = functools.partial(_encoder_kernel, no_imgnorm=no_imgnorm)

    # VMEM budget (conservative: assumes double-buffered x/out and weight),
    # clamped to [32 MiB, 64 MiB] so it is safe on v5e/v6e/v7x alike.
    vmem_est = (2 * tm * k_p * 2      # x tile, bf16, double buffered
                + 2 * k_p * e_p * 2   # weight, bf16 (worst case 2 buffers)
                + 2 * e_p * 4         # bias
                + 2 * tm * e_p * 4)   # out tile, f32, double buffered
    vmem_limit = int(min(max(2 * vmem_est, 32 << 20), 64 << 20))

    def run(single_buffer_consts):
        if single_buffer_consts:
            # Constant index_map (0, 0): one VMEM buffer is enough.
            w_spec = pl.BlockSpec((k_p, e_p), lambda i: (0, 0),
                                  pipeline_mode=pl.Buffered(1))
            b_spec = pl.BlockSpec((1, e_p), lambda i: (0, 0),
                                  pipeline_mode=pl.Buffered(1))
        else:
            w_spec = pl.BlockSpec((k_p, e_p), lambda i: (0, 0))
            b_spec = pl.BlockSpec((1, e_p), lambda i: (0, 0))
        return pl.pallas_call(
            kernel,
            out_shape=jax.ShapeDtypeStruct((n_p, e_p), jnp.float32),
            grid_spec=pltpu.PrefetchScalarGridSpec(
                num_scalar_prefetch=0,
                grid=grid,
                in_specs=[
                    pl.BlockSpec((tm, k_p), lambda i: (i, 0)),
                    w_spec,
                    b_spec,
                ],
                out_specs=pl.BlockSpec((tm, e_p), lambda i: (i, 0)),
            ),
            compiler_params=pltpu.CompilerParams(
                dimension_semantics=("parallel",),
                vmem_limit_bytes=vmem_limit),
        )(x_p, w_p, b_p)

    try:
        out = run(single_buffer_consts=True)
    except Exception:
        # pipeline_mode=pl.Buffered(1) not supported on this path in this jax
        # build -> fall back to default double-buffering (correctness is the
        # same, only the weight's VMEM footprint doubles).
        out = run(single_buffer_consts=False)

    # Strip the row / lane padding and restore the leading shape.
    return out[:n, :embed].reshape(*lead_shape, embed)


def init_params(img_dim, embed_size, key):
    """Xavier-uniform fc weight (as in _init_weights), zero bias."""
    r = np.sqrt(6.0) / np.sqrt(img_dim + embed_size)
    # PyTorch Linear weight is [embed_size, img_dim]; we store its transpose.
    w = jax.random.uniform(key, (embed_size, img_dim), jnp.float32, -r, r)
    weight_t = jnp.transpose(w)          # [img_dim, embed_size]
    bias = jnp.zeros((embed_size,), jnp.float32)
    return weight_t, bias


if __name__ == "__main__":
    key = jax.random.PRNGKey(0)
    k_w, k_x = jax.random.split(key)

    batch, n_regions, img_dim, embed_size = 2, 8, 32, 32
    weight_t, bias = init_params(img_dim, embed_size, k_w)
    images = jax.random.normal(k_x, (batch, n_regions, img_dim), jnp.float32)

    feats = encoder_image_precomp(images, weight_t, bias, no_imgnorm=False)
    feats = jax.block_until_ready(feats)

    # Reference in plain JAX.  The kernel uses bf16 matmul operands with f32
    # accumulation, so the reference rounds the operands to bf16 too; the
    # remaining tolerance covers summation order + approx reciprocal.
    xb = images.astype(jnp.bfloat16).astype(jnp.float32)
    wb = weight_t.astype(jnp.bfloat16).astype(jnp.float32)
    y_ref = jnp.einsum("bnd,de->bne", xb, wb) + bias
    norm_ref = jnp.sqrt(jnp.sum(y_ref ** 2, axis=-1, keepdims=True)) + 1e-8
    ref = y_ref / norm_ref
    np.testing.assert_allclose(np.asarray(feats), np.asarray(ref),
                               rtol=1e-2, atol=1e-2)

    # no_imgnorm branch (fc + bias only).
    feats_nonorm = encoder_image_precomp(images, weight_t, bias,
                                         no_imgnorm=True)
    feats_nonorm = jax.block_until_ready(feats_nonorm)
    np.testing.assert_allclose(np.asarray(feats_nonorm), np.asarray(y_ref),
                               rtol=2e-2, atol=2e-2)

    print("KERNEL_OK")
</pallas_src>

<mosaic_0001>
module attributes {stable_mosaic.version = 11 : i64} {
  func.func @_encoder_kernel(%arg0: i32, %arg1: memref<8x128xbf16, #tpu.memory_space<vmem>>, %arg2: memref<128x128xbf16, #tpu.memory_space<vmem>>, %arg3: memref<1x128xf32, #tpu.memory_space<vmem>>, %arg4: memref<8x128xf32, #tpu.memory_space<vmem>>) attributes {dimension_semantics = [#tpu.dimension_semantics<parallel>], iteration_bounds = array<i64: 2>, scalar_prefetch = 0 : i64, scratch_operands = 0 : i64, tpu.core_type = #tpu.core_type<tc>, window_params = [{transform_indices = @transform_0, window_bounds = array<i64: 8, 128>}, {pipeline_mode = #tpu.pipeline_mode<synchronous>, transform_indices = @transform_1, window_bounds = array<i64: 128, 128>}, {pipeline_mode = #tpu.pipeline_mode<synchronous>, transform_indices = @transform_2, window_bounds = array<i64: 1, 128>}, {transform_indices = @transform_3, window_bounds = array<i64: 8, 128>}]} {
    %c0 = arith.constant 0 : index
    %c0_0 = arith.constant 0 : index
    %0 = vector.load %arg1[%c0, %c0_0] : memref<8x128xbf16, #tpu.memory_space<vmem>>, vector<8x128xbf16>
    %c0_1 = arith.constant 0 : index
    %c0_2 = arith.constant 0 : index
    %1 = vector.load %arg2[%c0_1, %c0_2] : memref<128x128xbf16, #tpu.memory_space<vmem>>, vector<128x128xbf16>
    %cst = arith.constant dense<0.000000e+00> : vector<8x128xf32>
    %2 = tpu.matmul %0, %1, %cst {dimension_numbers = #tpu.dot_dimension_numbers<[1], [0], [0], [1], [0, 0, 1, 1], [], []>} : vector<8x128xbf16>, vector<128x128xbf16>, vector<8x128xf32> -> vector<8x128xf32>
    %c0_3 = arith.constant 0 : index
    %c0_4 = arith.constant 0 : index
    %3 = vector.load %arg3[%c0_3, %c0_4] : memref<1x128xf32, #tpu.memory_space<vmem>>, vector<1x128xf32>
    %4 = vector.broadcast %3 : vector<1x128xf32> to vector<8x128xf32>
    %5 = arith.addf %2, %4 : vector<8x128xf32>
    %6 = arith.mulf %5, %5 : vector<8x128xf32>
    %cst_5 = arith.constant dense<0.000000e+00> : vector<8xf32>
    %7 = vector.multi_reduction <add>, %6, %cst_5 [1] : vector<8x128xf32> to vector<8xf32>
    %8 = vector.shape_cast %7 : vector<8xf32> to vector<8x1xf32>
    %9 = math.sqrt %8 : vector<8x1xf32>
    %cst_6 = arith.constant 9.99999993E-9 : f32
    %10 = vector.broadcast %cst_6 : f32 to vector<8x1xf32>
    %11 = arith.addf %9, %10 : vector<8x1xf32>
    %12 = tpu.reciprocal %11 {approx = true} : vector<8x1xf32> -> vector<8x1xf32>
    %13 = vector.broadcast %12 : vector<8x1xf32> to vector<8x128xf32>
    %14 = arith.mulf %5, %13 : vector<8x128xf32>
    %c0_7 = arith.constant 0 : index
    %c0_8 = arith.constant 0 : index
    %15 = vector.load %arg4[%c0_7, %c0_8] : memref<8x128xf32, #tpu.memory_space<vmem>>, vector<8x128xf32>
    tpu.vector_store %arg4[%c0_7, %c0_8], %14 {strides = array<i32>} : memref<8x128xf32, #tpu.memory_space<vmem>>, vector<8x128xf32>,
    return
  }
  func.func @transform_0(%arg0: i32) -> (i32, i32) {
    %c0_i32 = arith.constant 0 : i32
    %c0_i32_0 = arith.constant 0 : i32
    return %arg0, %c0_i32 : i32, i32
  }
  func.func @transform_1(%arg0: i32) -> (i32, i32) {
    %c0_i32 = arith.constant 0 : i32
    %c0_i32_0 = arith.constant 0 : i32
    %c0_i32_1 = arith.constant 0 : i32
    return %c0_i32, %c0_i32_0 : i32, i32
  }
  func.func @transform_2(%arg0: i32) -> (i32, i32) {
    %c0_i32 = arith.constant 0 : i32
    %c0_i32_0 = arith.constant 0 : i32
    %c0_i32_1 = arith.constant 0 : i32
    return %c0_i32, %c0_i32_0 : i32, i32
  }
  func.func @transform_3(%arg0: i32) -> (i32, i32) {
    %c0_i32 = arith.constant 0 : i32
    %c0_i32_0 = arith.constant 0 : i32
    return %arg0, %c0_i32 : i32, i32
  }
}

module attributes {stable_mosaic.version = 11 : i64} {
  func.func @_encoder_kernel(%arg0: i32, %arg1: memref<8x128xbf16, #tpu.memory_space<vmem>>, %arg2: memref<128x128xbf16, #tpu.memory_space<vmem>>, %arg3: memref<1x128xf32, #tpu.memory_space<vmem>>, %arg4: memref<8x128xf32, #tpu.memory_space<vmem>>) attributes {dimension_semantics = [#tpu.dimension_semantics<parallel>], iteration_bounds = array<i64: 2>, scalar_prefetch = 0 : i64, scratch_operands = 0 : i64, tpu.core_type = #tpu.core_type<tc>, window_params = [{transform_indices = @transform_0, window_bounds = array<i64: 8, 128>}, {pipeline_mode = #tpu.pipeline_mode<synchronous>, transform_indices = @transform_1, window_bounds = array<i64: 128, 128>}, {pipeline_mode = #tpu.pipeline_mode<synchronous>, transform_indices = @transform_2, window_bounds = array<i64: 1, 128>}, {transform_indices = @transform_3, window_bounds = array<i64: 8, 128>}]} {
    %c0 = arith.constant 0 : index
    %c0_0 = arith.constant 0 : index
    %0 = vector.load %arg1[%c0, %c0_0] : memref<8x128xbf16, #tpu.memory_space<vmem>>, vector<8x128xbf16>
    %c0_1 = arith.constant 0 : index
    %c0_2 = arith.constant 0 : index
    %1 = vector.load %arg2[%c0_1, %c0_2] : memref<128x128xbf16, #tpu.memory_space<vmem>>, vector<128x128xbf16>
    %cst = arith.constant dense<0.000000e+00> : vector<8x128xf32>
    %2 = tpu.matmul %0, %1, %cst {dimension_numbers = #tpu.dot_dimension_numbers<[1], [0], [0], [1], [0, 0, 1, 1], [], []>} : vector<8x128xbf16>, vector<128x128xbf16>, vector<8x128xf32> -> vector<8x128xf32>
    %c0_3 = arith.constant 0 : index
    %c0_4 = arith.constant 0 : index
    %3 = vector.load %arg3[%c0_3, %c0_4] : memref<1x128xf32, #tpu.memory_space<vmem>>, vector<1x128xf32>
    %4 = vector.broadcast %3 : vector<1x128xf32> to vector<8x128xf32>
    %5 = arith.addf %2, %4 : vector<8x128xf32>
    %6 = arith.mulf %5, %5 : vector<8x128xf32>
    %cst_5 = arith.constant dense<0.000000e+00> : vector<8xf32>
    %7 = vector.multi_reduction <add>, %6, %cst_5 [1] : vector<8x128xf32> to vector<8xf32>
    %8 = vector.shape_cast %7 : vector<8xf32> to vector<8x1xf32>
    %9 = math.sqrt %8 : vector<8x1xf32>
    %cst_6 = arith.constant 9.99999993E-9 : f32
    %10 = vector.broadcast %cst_6 : f32 to vector<8x1xf32>
    %11 = arith.addf %9, %10 : vector<8x1xf32>
    %12 = tpu.reciprocal %11 {approx = true} : vector<8x1xf32> -> vector<8x1xf32>
    %13 = vector.broadcast %12 : vector<8x1xf32> to vector<8x128xf32>
    %14 = arith.mulf %5, %13 : vector<8x128xf32>
    %c0_7 = arith.constant 0 : index
    %c0_8 = arith.constant 0 : index
    %15 = vector.load %arg4[%c0_7, %c0_8] : memref<8x128xf32, #tpu.memory_space<vmem>>, vector<8x128xf32>
    tpu.vector_store %arg4[%c0_7, %c0_8], %14 {strides = array<i32>} : memref<8x128xf32, #tpu.memory_space<vmem>>, vector<8x128xf32>,
    return
  }
  func.func @transform_0(%arg0: i32) -> (i32, i32) {
    %c0_i32 = arith.constant 0 : i32
    %c0_i32_0 = arith.constant 0 : i32
    return %arg0, %c0_i32 : i32, i32
  }
  func.func @transform_1(%arg0: i32) -> (i32, i32) {
    %c0_i32 = arith.constant 0 : i32
    %c0_i32_0 = arith.constant 0 : i32
    %c0_i32_1 = arith.constant 0 : i32
    return %c0_i32, %c0_i32_0 : i32, i32
  }
  func.func @transform_2(%arg0: i32) -> (i32, i32) {
    %c0_i32 = arith.constant 0 : i32
    %c0_i32_0 = arith.constant 0 : i32
    %c0_i32_1 = arith.constant 0 : i32
    return %c0_i32, %c0_i32_0 : i32, i32
  }
  func.func @transform_3(%arg0: i32) -> (i32, i32) {
    %c0_i32 = arith.constant 0 : i32
    %c0_i32_0 = arith.constant 0 : i32
    return %arg0, %c0_i32 : i32, i32
  }
}

</mosaic_0001>

<bundles_post_ra>
// kernel: tpu_custom_call.1
= control target key start
LH: loop header
LB: loop body
LE: loop exit
PB: predicated region body
PF: predicated region fallthrough
CT: control target
= control target key end

     0   :  { %8 = vsyncpa [#allocation3], 0  ;;  %s859_s0 = inlined_call_operand.hbm [shape: bf16[16,128], index: 0, kind: input, shape index: {}]   ;;  %s860_s1 = inlined_call_operand.hbm [shape: bf16[128,128], index: 1, kind: input, shape index: {}]   ;;  %s861_s2 = inlined_call_operand.vmem [shape: f32[1,128], index: 2, kind: input, shape index: {}]   ;;  %s862_s3 = inlined_call_operand.hbm [shape: f32[16,128], index: 3, kind: output, shape index: {}]  }
   0x1   :  { %10 = vsyncpa [#allocation3 + $0x1], 0 }
   0x2   :  { %11 = vsyncpa [#allocation6], 0 }
   0x3   :  { %12 = vsyncpa [#allocation4], 0 }
   0x4   :  { %14 = vsyncpa [#allocation4 + $0x1], 0  ;;  %s698_s12 = smov 0   ;;  %s700_s13 = smov 0  }
   0x5   :  { %s702_s14 = smov 0   ;;  %s704_s15 = smov 0  }
   0x6 LB: > { %s719_s16 = sadd.s32 4294967295, %s669_s15   ;;  %s422_s17 = sadd.s32 4294967294, %s669_s15   ;;  %s669_s15 = sphi %s704_s15, %s884_s15   ;;  %s665_s14 = sphi %s702_s14, %s883_s14   ;;  %s661_s13 = sphi %s700_s13, %s882_s13   ;;  %s657_s12 = sphi %s698_s12, %s881_s12  }
   0x7   : > { %p40_p0 = scmp.ne.s32.totalorder %s661_s13, %s657_s12  ;;  %p863_p1 = scmp.eq.s32.totalorder %s719_s16, 0 }
   0x8   : > { %p112_p3 = scmp.eq.s32.totalorder %s422_s17, 1  ;;  %p423_p5 = scmp.ge.s32.totalorder %s669_s15, 1 }
   0x9   : > { %p728_p4 = por %p863_p1, %p40_p0  ;;  %p119_p7 = scmp.lt.s32.totalorder %s669_s15, 3 }
   0xa   : > { %p733_p6 = por %p112_p3, %p40_p0  ;;  %s671_s21 = smov [#allocation5]  }
   0xb   : > { %s867_s18 = scalar_select %p728_p4, 1, 0 }
   0xc   : > { %s868_s19 = scalar_select %p733_p6, 1, 0 }
   0xd   : > { %p738_p8 = pnand %p423_p5, %p119_p7  ;;  %s131_s22 = sshll.u32 %s671_s21, 4  ;;  %s132_s22 = int_to_ptr.vmem [resolvable:$true] %s131_s22 }
   0xe   : > { %s752_s24 = sadd.s32 1, %s669_s15   ;;  %s27_s25 = sadd.s32 1, %s665_s14 }
   0xf   : > { %s869_s20 = scalar_select %p738_p8, 1, 0 }
  0x10   : > { %p482_p9 = pneg %p738_p8  ;;  %s24_s26 = ssub.s32 %s669_s15, %s752_s24 }
  0x11   : > { %s558_s27 = scalar_lea.vmem %s132_s22, 1024  ;;  %p566_p5 = scmp.lt.s32.totalorder %s132_s22, %s132_s22 }
  0x12   : > { %p747_p11 = pnand %p482_p9, %p863_p1  ;;  %p559_p13 = scmp.ne.s32.totalorder %s132_s22, %s558_s27 }
  0x13   : > { %p567_p7 = scmp.lt.s32.totalorder %s558_s27, %s558_s27 }
  0x14   : > { %p549_p12 = pneg %p747_p11 }
  0x15   : > { %p568_p10 = por %p567_p7, %p566_p5 }
  0x16   : > { %p561_p0 = pnand %p559_p13, %p549_p12 }
  0x18   : > { %p562_p3 = pneg %p561_p0 }
  0x1a   : > { %p569_p2 = pnand %p568_p10, %p562_p3 }
  0x1c   : > { %572 = shalt.err (!%p569_p2)
}
  0x1d   : > { %s672_s28 = smov 64   ;;  %s673_s29 = smov 4  }
  0x1e   : > { %485 = dma.hbm_to_vmem [thread:$0]  (!%p747_p11), %s860_s1, 1024, %s132_s22, [#allocation6], %s672_s28, %s672_s28, %s673_s29  }
  0x1f   : > { %p25_p9 = scmp.eq.s32.totalorder %s24_s26, 0  ;;  %p34_p12 = scmp.ne.s32.totalorder %s665_s14, %s661_s13 }
  0x20   : > { %p35_p10 = scmp.eq.s32.totalorder %s669_s15, 0  ;;  %p495_p2 = scmp.lt.s32.totalorder %s669_s15, 2 }
  0x21   : > { %s769_s5 = scalar_select %p25_p9, %s665_s14, %s27_s25  }
  0x22   : > { %p36_p13 = por %p35_p10, %p34_p12  ;;  %p871_p0 = scmp.eq.s32.totalorder %s719_s16, 1 }
  0x23   : > { %s148_s7 = sand.u32 1, %s665_s14   ;;  %s427_s8 = sshll.u32 %s669_s15, 6 }
  0x24   : > { %p773_p3 = por %p871_p0, %p34_p12  ;;  %s426_s9 = sshll.u32 %s148_s7, 2 }
  0x25   : > { %s782_s17 = scalar_lea.hbm %s859_s0, %s427_s8  ;;  %s152_s21 = scalar_lea.vmem [#allocation2], %s426_s9 }
  0x26   : > { %s872_s6 = scalar_select %p773_p3, 1, 0 }
  0x27   : > { %s159_s22 = sshll.u32 %s152_s21, 4  ;;  %p784_p11 = pnand %p495_p2, %p36_p13  ;;  %s160_s22 = int_to_ptr.vmem [resolvable:$true] %s159_s22 }
  0x28   : > { %s149_s25 = scalar_lea.sflag [#allocation3], %s148_s7  ;;  %s573_s26 = scalar_lea.hbm %s782_s17, 64 }
  0x29   : > { %p574_p5 = scmp.ne.s32.totalorder %s782_s17, %s573_s26  ;;  %p575_p7 = pneg %p784_p11 }
  0x2a   : > { %s578_s29 = scalar_lea.hbm %s859_s0, 128  ;;  %p579_p10 = scmp.lt.s32.totalorder %s782_s17, %s859_s0 }
  0x2b   : > { %p576_p9 = pnand %p575_p7, %p574_p5  ;;  %p580_p2 = scmp.lt.s32.totalorder %s578_s29, %s573_s26 }
  0x2d   : > { %p577_p12 = pneg %p576_p9  ;;  %p581_p13 = por %p580_p2, %p579_p10 }
  0x2f   : > { %p582_p0 = pnand %p581_p13, %p577_p12 }
  0x31   : > { %585 = shalt.err (!%p582_p0)
}
  0x32   : > { %s586_s8 = scalar_lea.vmem %s160_s22, 64  ;;  %s674_s7 = smov [#allocation2]  }
  0x33   : > { %p587_p1 = scmp.ne.s32.totalorder %s160_s22, %s586_s8  ;;  %s591_s9 = sshll.u32 %s674_s7, 4  ;;  %s592_s9 = int_to_ptr.vmem [resolvable:$false] %s591_s9 }
  0x34   : > { %s593_s10 = scalar_lea.vmem %s592_s9, 128  ;;  %p594_p5 = scmp.lt.s32.totalorder %s160_s22, %s592_s9 }
  0x35   : > { %p589_p6 = pnand %p587_p1, %p575_p7  ;;  %p595_p9 = scmp.lt.s32.totalorder %s593_s10, %s586_s8 }
  0x37   : > { %p590_p3 = pneg %p589_p6  ;;  %p596_p4 = por %p595_p9, %p594_p5 }
  0x39   : > { %p597_p8 = pnand %p596_p4, %p590_p3 }
  0x3b   : > { %600 = shalt.err (!%p597_p8)
}
  0x3c   : > { %489 = dma.hbm_to_vmem [thread:$0]  (!%p784_p11), %s782_s17, 64, %s160_s22, %s149_s25  }
  0x3d   : > { %p874_p12 = scmp.ne.s32.totalorder %s869_s20, 0 }
  0x3e   : > { %s805_s11 = sand.u32 (!%p874_p12), 1, %s661_s13   ;;  %p875_p1 = scmp.ne.s32.totalorder (!%p874_p12), %s867_s18, 0 }
  0x3f   : > { %168 = sbr.rel (%p874_p12) target bundleno = 489 (0x1e9), region = 32  ;;  %s429_s21 = sshll.u32 (!%p874_p12), %s805_s11, 2 }
  0x40   : > { %s171_s26 = scalar_lea.sflag (!%p874_p12), [#allocation3], %s805_s11  ;;  %s809_s27 = scalar_lea.vmem (!%p874_p12), [#allocation2], %s429_s21 }
  0x44   : > { %644 = dma.done.wait (%p875_p1), %s171_s26, 64  }
  0x45   : > { %646 = vsyncadd (%p875_p1), %s171_s26, 4294967232  ;;  %p876_p4 = scmp.eq.s32.totalorder %s719_s16, 0 }
  0x47   : > { %648 = dma.done.wait (%p876_p4), [#allocation6], 1024   ;;  %p877_p6 = pmov %p876_p4 }
  0x48   : > { %v675_v0 = vmov 0.0   ;;  %vm676_vm0 = vmmov 0   ;;  %v535_v1 = vld [vmem:[#allocation5 + $0x38] sm:$0xff]   ;;  %v536_v2 = vld [vmem:[#allocation5 + $0x30] sm:$0xff]   ;;  %v537_v3 = vld [vmem:[#allocation5 + $0x28] sm:$0xff]   ;;  %s431_s17 = sshll.u32 %s805_s11, 3 }
  0x49   : > { %650 = vsyncadd (%p877_p6), [#allocation6], 4294966272  ;;  %454 = vmatprep.subr.bf16.mxu0 %v675_v0  ;;  %470 = vmatprep.mubr.msk.bf16.mxu0 %vm676_vm0, %v675_v0  ;;  %v538_v4 = vld [vmem:[#allocation5 + $0x20] sm:$0xff]   ;;  %v539_v5 = vld [vmem:[#allocation5 + $0x18] sm:$0xff]   ;;  %s442_s22 = sshll.u32 %s719_s16, 7  ;;  %s200_s23 = scalar_lea.vmem [#allocation7], %s431_s17 }
  0x4a   : > { %455 = vmatpush3.bf16.msra.mxu0 %v535_v1  ;;  %v540_v6 = vld [vmem:[#allocation5 + $0x10] sm:$0xff]   ;;  %v541_v7 = vld [vmem:[#allocation5 + $0x8] sm:$0xff]   ;;  %v542_v8 = vld [vmem:[#allocation5] sm:$0xff]   ;;  %s342_s25 = sshll.u32 %s200_s23, 4  ;;  %s340_s30 = scalar_lea.hbm %s862_s3, %s442_s22  ;;  %s343_s25 = int_to_ptr.vmem [resolvable:$true] %s342_s25 }
  0x4b   : > { %456 = vmatprep.subr.bf16.mxu0 %v675_v0  ;;  %v202_v9 = vld [vmem:[%s809_s27] sm:$0xf]  ;;  %s329_s4 = scalar_lea.sflag [#allocation4], %s805_s11  ;;  %s601_s8 = scalar_lea.vmem %s343_s25, 128 }
  0x4c   : > { %v432_v10 = vld [vmem:[%s861_s2] ss:$0 sm:$0xff]  ;;  %p602_p8 = scmp.ne.s32.totalorder %s343_s25, %s601_s8  ;;  %p878_p3 = scmp.ne.s32.totalorder %s872_s6, 0 }
  0x4d   : > { %s677_s7 = smov [#allocation7]  }
  0x4e   : > { %457 = vmatpush3.bf16.msra.mxu0 %v536_v2  ;;  %p603_p11 = pnand %p602_p8, %p878_p3  ;;  %s605_s9 = sshll.u32 %s677_s7, 4  ;;  %s606_s9 = int_to_ptr.vmem [resolvable:$false] %s605_s9 }
  0x4f   : > { %458 = vmatprep.subr.bf16.mxu0 %v675_v0  ;;  %s607_s16 = scalar_lea.vmem %s606_s9, 256  ;;  %p608_p10 = scmp.lt.s32.totalorder %s343_s25, %s606_s9 }
  0x50   : > { %p604_p7 = pneg %p603_p11  ;;  %p609_p2 = scmp.lt.s32.totalorder %s607_s16, %s601_s8 }
  0x52   : > { %459 = vmatpush3.bf16.msra.mxu0 %v537_v3  ;;  %p610_p13 = por %p609_p2, %p608_p10 }
  0x53   : > { %460 = vmatprep.subr.bf16.mxu0 %v675_v0 }
  0x54   : > { %p611_p0 = pnand %p610_p13, %p604_p7 }
  0x56   : > { %461 = vmatpush3.bf16.msra.mxu0 %v538_v4 }
  0x57   : > { %462 = vmatprep.subr.bf16.mxu0 %v675_v0 }
  0x5a   : > { %463 = vmatpush3.bf16.msra.mxu0 %v539_v5 }
  0x5b   : > { %464 = vmatprep.subr.bf16.mxu0 %v675_v0 }
  0x5e   : > { %465 = vmatpush3.bf16.msra.mxu0 %v540_v6 }
  0x5f   : > { %466 = vmatprep.subr.bf16.mxu0 %v675_v0 }
  0x62   : > { %467 = vmatpush3.bf16.msra.mxu0 %v541_v7 }
  0x63   : > { %468 = vmatprep.subr.bf16.mxu0 %v675_v0 }
  0x66   : > { %469 = vmatpush3.bf16.msra.mxu0 %v542_v8 }
  0x69   : > { %471 = vmatmul.mubr.bf16.vlgmr.msra.gmra.mxu0 %v202_v9 }
 0x129   : > { %v308_v11 = vpop.f32.mrf.mxu0 }
 0x12a   : > { %v309_v12 = vadd.f32 %v432_v10, %v308_v11 }
 0x12b   : > { %v472_v13 = vpop.f32.mrf.mxu0 }
 0x12c   : > { %v314_v14 = vmul.f32 %v309_v12, %v309_v12 }
 0x12d   : > { %v311_v15 = vpop.f32.mrf.mxu0 }
 0x12e   : > { %315 = vadd.xlane.f32.xlu0 %v314_v14 }
 0x12f   : > { %v473_v16 = vpop.f32.mrf.mxu0 }
 0x1b7   : > { %v316_v17 = vpop.xlane.xlu0 %315 }
 0x1b8   : > { %543 = vrsqrt.f32 %v316_v17  ;;  %vm319_vm1 = vcmp.eq.f32.partialorder %v316_v17, inf  ;;  %v322_v20 = vand.u32 2147483648, %v316_v17  ;;  %vm321_vm2 = vcmp.eq.f32.partialorder %v316_v17, 0.0 }
 0x1c5   : > { %v544_v18 = vpop.eup %543 }
 0x1c6   : > { %v318_v19 = vmul.f32 %v544_v18, %v316_v17 }
 0x1c8   : > { %v320_v21 = vsel %vm319_vm1, %v316_v17, %v318_v19 }
 0x1c9   : > { %v323_v22 = vsel %vm321_vm2, %v322_v20, %v320_v21 }
 0x1ca   : > { %v324_v23 = vadd.f32 1e-08, %v323_v22 }
 0x1cc   : > { %545 = vrcp.f32 %v324_v23 }
 0x1d9   : > { %v546_v24 = vpop.eup %545 }
 0x1da   : > { %v326_v25 = vmul.f32 %v546_v24, %v309_v12 }
 0x1dc   : > { %327 = vst [vmem:[%s200_s23] sm:$0xff] %v326_v25 }
 0x1dd   : > { %614 = shalt.err (!%p611_p0)
}
 0x1de   : > { %s615_s10 = scalar_lea.hbm %s340_s30, 128  ;;  %s619_s26 = scalar_lea.hbm %s862_s3, 256 }
 0x1df   : > { %p616_p5 = scmp.ne.s32.totalorder %s340_s30, %s615_s10  ;;  %p620_p1 = scmp.lt.s32.totalorder %s340_s30, %s862_s3 }
 0x1e0   : > { %p621_p4 = scmp.lt.s32.totalorder %s619_s26, %s615_s10 }
 0x1e1   : > { %p617_p9 = pnand %p616_p5, %p878_p3 }
 0x1e2   : > { %p622_p6 = por %p621_p4, %p620_p1 }
 0x1e3   : > { %p618_p12 = pneg %p617_p9 }
 0x1e5   : > { %p623_p8 = pnand %p622_p6, %p618_p12 }
 0x1e7   : > { %626 = shalt.err (!%p623_p8)
}
 0x1e8   : > { %480 = dma.vmem_to_hbm [thread:$0]  (%p878_p3), %s343_s25, 128, %s340_s30, %s329_s4  }
 0x1e9 PF: > { %s354_s20 = sand.u32 1, %s657_s12   ;;  %p879_p11 = scmp.ne.s32.totalorder %s868_s19, 0 }
 0x1ea   : > { %p880_p7 = scmp.ge.s32.totalorder %s669_s15, 2  ;;  %s355_s17 = scalar_lea.sflag [#allocation4], %s354_s20 }
 0x1ec   : > { %p491_p10 = pnand %p880_p7, %p879_p11 }
 0x1ee   : > { %p492_p2 = pneg %p491_p10 }
 0x1f0   : > { %652 = dma.done.wait (%p492_p2), %s355_s17, 128  }
 0x1f1   : > { %654 = vsyncadd (%p492_p2), %s355_s17, 4294967168  ;;  %p17_p13 = scmp.ge.s32.totalorder %s752_s24, 4   ;;  %s881_s12 = smov %s661_s13 }
 0x1f2   : > { %s882_s13 = smov %s665_s14  ;;  %s883_s14 = smov %s769_s5 }
 0x1f3   : > { %s884_s15 = smov %s752_s24  ;;  %19 = sbr.rel (!%p17_p13) target bundleno = 6 (0x6), region = 81 }
 0x1f8   :  { %360 = vsyncpa [#allocation3], 1 }
 0x1f9   :  { %362 = vsyncpa [#allocation3 + $0x1], 1 }
 0x1fa   :  { %363 = vsyncpa [#allocation6], 1 }
 0x1fb   :  { %364 = vsyncpa [#allocation4], 1 }
 0x1fc   :  { %366 = vsyncpa [#allocation4 + $0x1], 1 }

// kernel: tpu_custom_call.1
= control target key start
LH: loop header
LB: loop body
LE: loop exit
PB: predicated region body
PF: predicated region fallthrough
CT: control target
= control target key end

     0   :  { %8 = vsyncpa [#allocation3], 0  ;;  %s859_s0 = inlined_call_operand.hbm [shape: bf16[16,128], index: 0, kind: input, shape index: {}]   ;;  %s860_s1 = inlined_call_operand.hbm [shape: bf16[128,128], index: 1, kind: input, shape index: {}]   ;;  %s861_s2 = inlined_call_operand.vmem [shape: f32[1,128], index: 2, kind: input, shape index: {}]   ;;  %s862_s3 = inlined_call_operand.hbm [shape: f32[16,128], index: 3, kind: output, shape index: {}]  }
   0x1   :  { %10 = vsyncpa [#allocation3 + $0x1], 0 }
   0x2   :  { %11 = vsyncpa [#allocation6], 0 }
   0x3   :  { %12 = vsyncpa [#allocation4], 0 }
   0x4   :  { %14 = vsyncpa [#allocation4 + $0x1], 0  ;;  %s698_s12 = smov 0   ;;  %s700_s13 = smov 0  }
   0x5   :  { %s702_s14 = smov 0   ;;  %s704_s15 = smov 0  }
   0x6 LB: > { %s719_s16 = sadd.s32 4294967295, %s669_s15   ;;  %s422_s17 = sadd.s32 4294967294, %s669_s15   ;;  %s669_s15 = sphi %s704_s15, %s884_s15   ;;  %s665_s14 = sphi %s702_s14, %s883_s14   ;;  %s661_s13 = sphi %s700_s13, %s882_s13   ;;  %s657_s12 = sphi %s698_s12, %s881_s12  }
   0x7   : > { %p40_p0 = scmp.ne.s32.totalorder %s661_s13, %s657_s12  ;;  %p863_p1 = scmp.eq.s32.totalorder %s719_s16, 0 }
   0x8   : > { %p112_p3 = scmp.eq.s32.totalorder %s422_s17, 1  ;;  %p423_p5 = scmp.ge.s32.totalorder %s669_s15, 1 }
   0x9   : > { %p728_p4 = por %p863_p1, %p40_p0  ;;  %p119_p7 = scmp.lt.s32.totalorder %s669_s15, 3 }
   0xa   : > { %p733_p6 = por %p112_p3, %p40_p0  ;;  %s671_s21 = smov [#allocation5]  }
   0xb   : > { %s867_s18 = scalar_select %p728_p4, 1, 0 }
   0xc   : > { %s868_s19 = scalar_select %p733_p6, 1, 0 }
   0xd   : > { %p738_p8 = pnand %p423_p5, %p119_p7  ;;  %s131_s22 = sshll.u32 %s671_s21, 4  ;;  %s132_s22 = int_to_ptr.vmem [resolvable:$true] %s131_s22 }
   0xe   : > { %s752_s24 = sadd.s32 1, %s669_s15   ;;  %s27_s25 = sadd.s32 1, %s665_s14 }
   0xf   : > { %s869_s20 = scalar_select %p738_p8, 1, 0 }
  0x10   : > { %p482_p9 = pneg %p738_p8  ;;  %s24_s26 = ssub.s32 %s669_s15, %s752_s24 }
  0x11   : > { %s558_s27 = scalar_lea.vmem %s132_s22, 1024  ;;  %p566_p5 = scmp.lt.s32.totalorder %s132_s22, %s132_s22 }
  0x12   : > { %p747_p11 = pnand %p482_p9, %p863_p1  ;;  %p559_p13 = scmp.ne.s32.totalorder %s132_s22, %s558_s27 }
  0x13   : > { %p567_p7 = scmp.lt.s32.totalorder %s558_s27, %s558_s27 }
  0x14   : > { %p549_p12 = pneg %p747_p11 }
  0x15   : > { %p568_p10 = por %p567_p7, %p566_p5 }
  0x16   : > { %p561_p0 = pnand %p559_p13, %p549_p12 }
  0x18   : > { %p562_p3 = pneg %p561_p0 }
  0x1a   : > { %p569_p2 = pnand %p568_p10, %p562_p3 }
  0x1c   : > { %572 = shalt.err (!%p569_p2)
}
  0x1d   : > { %s672_s28 = smov 64   ;;  %s673_s29 = smov 4  }
  0x1e   : > { %485 = dma.hbm_to_vmem [thread:$0]  (!%p747_p11), %s860_s1, 1024, %s132_s22, [#allocation6], %s672_s28, %s672_s28, %s673_s29  }
  0x1f   : > { %p25_p9 = scmp.eq.s32.totalorder %s24_s26, 0  ;;  %p34_p12 = scmp.ne.s32.totalorder %s665_s14, %s661_s13 }
  0x20   : > { %p35_p10 = scmp.eq.s32.totalorder %s669_s15, 0  ;;  %p495_p2 = scmp.lt.s32.totalorder %s669_s15, 2 }
  0x21   : > { %s769_s5 = scalar_select %p25_p9, %s665_s14, %s27_s25  }
  0x22   : > { %p36_p13 = por %p35_p10, %p34_p12  ;;  %p871_p0 = scmp.eq.s32.totalorder %s719_s16, 1 }
  0x23   : > { %s148_s7 = sand.u32 1, %s665_s14   ;;  %s427_s8 = sshll.u32 %s669_s15, 6 }
  0x24   : > { %p773_p3 = por %p871_p0, %p34_p12  ;;  %s426_s9 = sshll.u32 %s148_s7, 2 }
  0x25   : > { %s782_s17 = scalar_lea.hbm %s859_s0, %s427_s8  ;;  %s152_s21 = scalar_lea.vmem [#allocation2], %s426_s9 }
  0x26   : > { %s872_s6 = scalar_select %p773_p3, 1, 0 }
  0x27   : > { %s159_s22 = sshll.u32 %s152_s21, 4  ;;  %p784_p11 = pnand %p495_p2, %p36_p13  ;;  %s160_s22 = int_to_ptr.vmem [resolvable:$true] %s159_s22 }
  0x28   : > { %s149_s25 = scalar_lea.sflag [#allocation3], %s148_s7  ;;  %s573_s26 = scalar_lea.hbm %s782_s17, 64 }
  0x29   : > { %p574_p5 = scmp.ne.s32.totalorder %s782_s17, %s573_s26  ;;  %p575_p7 = pneg %p784_p11 }
  0x2a   : > { %s578_s29 = scalar_lea.hbm %s859_s0, 128  ;;  %p579_p10 = scmp.lt.s32.totalorder %s782_s17, %s859_s0 }
  0x2b   : > { %p576_p9 = pnand %p575_p7, %p574_p5  ;;  %p580_p2 = scmp.lt.s32.totalorder %s578_s29, %s573_s26 }
  0x2d   : > { %p577_p12 = pneg %p576_p9  ;;  %p581_p13 = por %p580_p2, %p579_p10 }
  0x2f   : > { %p582_p0 = pnand %p581_p13, %p577_p12 }
  0x31   : > { %585 = shalt.err (!%p582_p0)
}
  0x32   : > { %s586_s8 = scalar_lea.vmem %s160_s22, 64  ;;  %s674_s7 = smov [#allocation2]  }
  0x33   : > { %p587_p1 = scmp.ne.s32.totalorder %s160_s22, %s586_s8  ;;  %s591_s9 = sshll.u32 %s674_s7, 4  ;;  %s592_s9 = int_to_ptr.vmem [resolvable:$false] %s591_s9 }
  0x34   : > { %s593_s10 = scalar_lea.vmem %s592_s9, 128  ;;  %p594_p5 = scmp.lt.s32.totalorder %s160_s22, %s592_s9 }
  0x35   : > { %p589_p6 = pnand %p587_p1, %p575_p7  ;;  %p595_p9 = scmp.lt.s32.totalorder %s593_s10, %s586_s8 }
  0x37   : > { %p590_p3 = pneg %p589_p6  ;;  %p596_p4 = por %p595_p9, %p594_p5 }
  0x39   : > { %p597_p8 = pnand %p596_p4, %p590_p3 }
  0x3b   : > { %600 = shalt.err (!%p597_p8)
}
  0x3c   : > { %489 = dma.hbm_to_vmem [thread:$0]  (!%p784_p11), %s782_s17, 64, %s160_s22, %s149_s25  }
  0x3d   : > { %p874_p12 = scmp.ne.s32.totalorder %s869_s20, 0 }
  0x3e   : > { %s805_s11 = sand.u32 (!%p874_p12), 1, %s661_s13   ;;  %p875_p1 = scmp.ne.s32.totalorder (!%p874_p12), %s867_s18, 0 }
  0x3f   : > { %168 = sbr.rel (%p874_p12) target bundleno = 489 (0x1e9), region = 32  ;;  %s429_s21 = sshll.u32 (!%p874_p12), %s805_s11, 2 }
  0x40   : > { %s171_s26 = scalar_lea.sflag (!%p874_p12), [#allocation3], %s805_s11  ;;  %s809_s27 = scalar_lea.vmem (!%p874_p12), [#allocation2], %s429_s21 }
  0x44   : > { %644 = dma.done.wait (%p875_p1), %s171_s26, 64  }
  0x45   : > { %646 = vsyncadd (%p875_p1), %s171_s26, 4294967232  ;;  %p876_p4 = scmp.eq.s32.totalorder %s719_s16, 0 }
  0x47   : > { %648 = dma.done.wait (%p876_p4), [#allocation6], 1024   ;;  %p877_p6 = pmov %p876_p4 }
  0x48   : > { %v675_v0 = vmov 0.0   ;;  %vm676_vm0 = vmmov 0   ;;  %v535_v1 = vld [vmem:[#allocation5 + $0x38] sm:$0xff]   ;;  %v536_v2 = vld [vmem:[#allocation5 + $0x30] sm:$0xff]   ;;  %v537_v3 = vld [vmem:[#allocation5 + $0x28] sm:$0xff]   ;;  %s431_s17 = sshll.u32 %s805_s11, 3 }
  0x49   : > { %650 = vsyncadd (%p877_p6), [#allocation6], 4294966272  ;;  %454 = vmatprep.subr.bf16.mxu0 %v675_v0  ;;  %470 = vmatprep.mubr.msk.bf16.mxu0 %vm676_vm0, %v675_v0  ;;  %v538_v4 = vld [vmem:[#allocation5 + $0x20] sm:$0xff]   ;;  %v539_v5 = vld [vmem:[#allocation5 + $0x18] sm:$0xff]   ;;  %s442_s22 = sshll.u32 %s719_s16, 7  ;;  %s200_s23 = scalar_lea.vmem [#allocation7], %s431_s17 }
  0x4a   : > { %455 = vmatpush3.bf16.msra.mxu0 %v535_v1  ;;  %v540_v6 = vld [vmem:[#allocation5 + $0x10] sm:$0xff]   ;;  %v541_v7 = vld [vmem:[#allocation5 + $0x8] sm:$0xff]   ;;  %v542_v8 = vld [vmem:[#allocation5] sm:$0xff]   ;;  %s342_s25 = sshll.u32 %s200_s23, 4  ;;  %s340_s30 = scalar_lea.hbm %s862_s3, %s442_s22  ;;  %s343_s25 = int_to_ptr.vmem [resolvable:$true] %s342_s25 }
  0x4b   : > { %456 = vmatprep.subr.bf16.mxu0 %v675_v0  ;;  %v202_v9 = vld [vmem:[%s809_s27] sm:$0xf]  ;;  %s329_s4 = scalar_lea.sflag [#allocation4], %s805_s11  ;;  %s601_s8 = scalar_lea.vmem %s343_s25, 128 }
  0x4c   : > { %v432_v10 = vld [vmem:[%s861_s2] ss:$0 sm:$0xff]  ;;  %p602_p8 = scmp.ne.s32.totalorder %s343_s25, %s601_s8  ;;  %p878_p3 = scmp.ne.s32.totalorder %s872_s6, 0 }
  0x4d   : > { %s677_s7 = smov [#allocation7]  }
  0x4e   : > { %457 = vmatpush3.bf16.msra.mxu0 %v536_v2  ;;  %p603_p11 = pnand %p602_p8, %p878_p3  ;;  %s605_s9 = sshll.u32 %s677_s7, 4  ;;  %s606_s9 = int_to_ptr.vmem [resolvable:$false] %s605_s9 }
  0x4f   : > { %458 = vmatprep.subr.bf16.mxu0 %v675_v0  ;;  %s607_s16 = scalar_lea.vmem %s606_s9, 256  ;;  %p608_p10 = scmp.lt.s32.totalorder %s343_s25, %s606_s9 }
  0x50   : > { %p604_p7 = pneg %p603_p11  ;;  %p609_p2 = scmp.lt.s32.totalorder %s607_s16, %s601_s8 }
  0x52   : > { %459 = vmatpush3.bf16.msra.mxu0 %v537_v3  ;;  %p610_p13 = por %p609_p2, %p608_p10 }
  0x53   : > { %460 = vmatprep.subr.bf16.mxu0 %v675_v0 }
  0x54   : > { %p611_p0 = pnand %p610_p13, %p604_p7 }
  0x56   : > { %461 = vmatpush3.bf16.msra.mxu0 %v538_v4 }
  0x57   : > { %462 = vmatprep.subr.bf16.mxu0 %v675_v0 }
  0x5a   : > { %463 = vmatpush3.bf16.msra.mxu0 %v539_v5 }
  0x5b   : > { %464 = vmatprep.subr.bf16.mxu0 %v675_v0 }
  0x5e   : > { %465 = vmatpush3.bf16.msra.mxu0 %v540_v6 }
  0x5f   : > { %466 = vmatprep.subr.bf16.mxu0 %v675_v0 }
  0x62   : > { %467 = vmatpush3.bf16.msra.mxu0 %v541_v7 }
  0x63   : > { %468 = vmatprep.subr.bf16.mxu0 %v675_v0 }
  0x66   : > { %469 = vmatpush3.bf16.msra.mxu0 %v542_v8 }
  0x69   : > { %471 = vmatmul.mubr.bf16.vlgmr.msra.gmra.mxu0 %v202_v9 }
 0x129   : > { %v308_v11 = vpop.f32.mrf.mxu0 }
 0x12a   : > { %v309_v12 = vadd.f32 %v432_v10, %v308_v11 }
 0x12b   : > { %v472_v13 = vpop.f32.mrf.mxu0 }
 0x12c   : > { %v314_v14 = vmul.f32 %v309_v12, %v309_v12 }
 0x12d   : > { %v311_v15 = vpop.f32.mrf.mxu0 }
 0x12e   : > { %315 = vadd.xlane.f32.xlu0 %v314_v14 }
 0x12f   : > { %v473_v16 = vpop.f32.mrf.mxu0 }
 0x1b7   : > { %v316_v17 = vpop.xlane.xlu0 %315 }
 0x1b8   : > { %543 = vrsqrt.f32 %v316_v17  ;;  %vm319_vm1 = vcmp.eq.f32.partialorder %v316_v17, inf  ;;  %v322_v20 = vand.u32 2147483648, %v316_v17  ;;  %vm321_vm2 = vcmp.eq.f32.partialorder %v316_v17, 0.0 }
 0x1c5   : > { %v544_v18 = vpop.eup %543 }
 0x1c6   : > { %v318_v19 = vmul.f32 %v544_v18, %v316_v17 }
 0x1c8   : > { %v320_v21 = vsel %vm319_vm1, %v316_v17, %v318_v19 }
 0x1c9   : > { %v323_v22 = vsel %vm321_vm2, %v322_v20, %v320_v21 }
 0x1ca   : > { %v324_v23 = vadd.f32 1e-08, %v323_v22 }
 0x1cc   : > { %545 = vrcp.f32 %v324_v23 }
 0x1d9   : > { %v546_v24 = vpop.eup %545 }
 0x1da   : > { %v326_v25 = vmul.f32 %v546_v24, %v309_v12 }
 0x1dc   : > { %327 = vst [vmem:[%s200_s23] sm:$0xff] %v326_v25 }
 0x1dd   : > { %614 = shalt.err (!%p611_p0)
}
 0x1de   : > { %s615_s10 = scalar_lea.hbm %s340_s30, 128  ;;  %s619_s26 = scalar_lea.hbm %s862_s3, 256 }
 0x1df   : > { %p616_p5 = scmp.ne.s32.totalorder %s340_s30, %s615_s10  ;;  %p620_p1 = scmp.lt.s32.totalorder %s340_s30, %s862_s3 }
 0x1e0   : > { %p621_p4 = scmp.lt.s32.totalorder %s619_s26, %s615_s10 }
 0x1e1   : > { %p617_p9 = pnand %p616_p5, %p878_p3 }
 0x1e2   : > { %p622_p6 = por %p621_p4, %p620_p1 }
 0x1e3   : > { %p618_p12 = pneg %p617_p9 }
 0x1e5   : > { %p623_p8 = pnand %p622_p6, %p618_p12 }
 0x1e7   : > { %626 = shalt.err (!%p623_p8)
}
 0x1e8   : > { %480 = dma.vmem_to_hbm [thread:$0]  (%p878_p3), %s343_s25, 128, %s340_s30, %s329_s4  }
 0x1e9 PF: > { %s354_s20 = sand.u32 1, %s657_s12   ;;  %p879_p11 = scmp.ne.s32.totalorder %s868_s19, 0 }
 0x1ea   : > { %p880_p7 = scmp.ge.s32.totalorder %s669_s15, 2  ;;  %s355_s17 = scalar_lea.sflag [#allocation4], %s354_s20 }
 0x1ec   : > { %p491_p10 = pnand %p880_p7, %p879_p11 }
 0x1ee   : > { %p492_p2 = pneg %p491_p10 }
 0x1f0   : > { %652 = dma.done.wait (%p492_p2), %s355_s17, 128  }
 0x1f1   : > { %654 = vsyncadd (%p492_p2), %s355_s17, 4294967168  ;;  %p17_p13 = scmp.ge.s32.totalorder %s752_s24, 4   ;;  %s881_s12 = smov %s661_s13 }
 0x1f2   : > { %s882_s13 = smov %s665_s14  ;;  %s883_s14 = smov %s769_s5 }
 0x1f3   : > { %s884_s15 = smov %s752_s24  ;;  %19 = sbr.rel (!%p17_p13) target bundleno = 6 (0x6), region = 81 }
 0x1f8   :  { %360 = vsyncpa [#allocation3], 1 }
 0x1f9   :  { %362 = vsyncpa [#allocation3 + $0x1], 1 }
 0x1fa   :  { %363 = vsyncpa [#allocation6], 1 }
 0x1fb   :  { %364 = vsyncpa [#allocation4], 1 }
 0x1fc   :  { %366 = vsyncpa [#allocation4 + $0x1], 1 }

</bundles_post_ra>
